<compile_context>
chip_gen: v6e
topology: v6e:2x2x1
jax: 0.10.0
libtpu: 0.0.40
codegen_flags: <defaults>
</compile_context>

<pallas_src>
import functools

import jax
import jax.numpy as jnp
from jax.experimental import pallas as pl
from jax.experimental.pallas import tpu as pltpu

_SUBLANE = 8


def _round_up(v, m):
    return (v + m - 1) // m * m


def _pick_tm(n_rows, f, *, n_bufs, budget_bytes=12 << 20, max_tm=2048):
    """Largest row tile (multiple of 8) whose double-buffered f32 working set
    fits `budget_bytes` (conservative enough for v5e's 16 MiB default scoped
    VMEM; well under v7x's 64 MiB physical VMEM)."""
    bytes_per_row = max(n_bufs * f * 4, 1)
    tm = budget_bytes // bytes_per_row
    tm = min(tm, max_tm, _round_up(n_rows, _SUBLANE))
    tm = max(_SUBLANE, (tm // _SUBLANE) * _SUBLANE)
    return tm


# ----------------------------- fit (var_mean) ------------------------------

def _fit_kernel(x_ref, sum_ref, sq_ref):
    # Grid = (shard, row_tile); row_tile is the reduction axis (last, "arbitrary").
    i = pl.program_id(1)

    @pl.when(i == 0)
    def _():
        sum_ref[...] = jnp.zeros_like(sum_ref)
        sq_ref[...] = jnp.zeros_like(sq_ref)

    xb = x_ref[...].astype(jnp.float32)
    tm, f = xb.shape
    # (tm, F) -> (tm//8, 8, F): reduce over the leading axis = plain vreg adds,
    # keeping 8 sublane-parallel partial sums (no per-step cross-sublane reduce).
    xb3 = xb.reshape(tm // _SUBLANE, _SUBLANE, f)
    sum_ref[...] += jnp.sum(xb3, axis=0)
    sq_ref[...] += jnp.sum(xb3 * xb3, axis=0)


def scaler_fit(x, *, tm=None, n_shards=None):
    """Returns (mean, std), each of shape (1, F), matching
    torch.var_mean(x, dim=0, correction=0) followed by sqrt."""
    n, f = x.shape
    if tm is None:
        tm = _pick_tm(n, f, n_bufs=2)            # only x is double-buffered
    n_tiles = pl.cdiv(n, tm)
    if n_shards is None:
        # Megacore-shardable axis for v7x (2 TCs); harmless on v5e/v6e.
        n_shards = 2 if n_tiles >= 2 else 1
    tiles_per_shard = pl.cdiv(n_tiles, n_shards)
    n_pad = n_shards * tiles_per_shard * tm
    xp = jnp.pad(x, ((0, n_pad - n), (0, 0))) if n_pad != n else x

    part_sum, part_sq = pl.pallas_call(
        _fit_kernel,
        out_shape=(
            jax.ShapeDtypeStruct((n_shards * _SUBLANE, f), jnp.float32),
            jax.ShapeDtypeStruct((n_shards * _SUBLANE, f), jnp.float32),
        ),
        grid_spec=pltpu.PrefetchScalarGridSpec(
            num_scalar_prefetch=0,
            grid=(n_shards, tiles_per_shard),
            in_specs=[
                pl.BlockSpec((tm, f),
                             lambda s, i, tps=tiles_per_shard: (s * tps + i, 0)),
            ],
            out_specs=(
                pl.BlockSpec((_SUBLANE, f), lambda s, i: (s, 0)),
                pl.BlockSpec((_SUBLANE, f), lambda s, i: (s, 0)),
            ),
        ),
        compiler_params=pltpu.CompilerParams(
            dimension_semantics=("parallel", "arbitrary")),
    )(xp)

    # Tiny finalize in plain JAX: collapse shard/sublane partials, then mean/std.
    total_sum = jnp.sum(part_sum, axis=0, keepdims=True)     # (1, F)
    total_sq = jnp.sum(part_sq, axis=0, keepdims=True)       # (1, F)
    inv_n = jnp.float32(1.0 / n)
    mean = total_sum * inv_n
    var = jnp.maximum(total_sq * inv_n - mean * mean, 0.0)   # correction=0
    std = jnp.sqrt(var)
    return mean, std


# ------------------------------ forward (scale) -----------------------------

def _scale_kernel(x_ref, mean_ref, std_ref, o_ref, *, with_mean):
    # One reciprocal per feature column (amortized over tm rows) instead of a
    # per-element divide.
    inv = pl.reciprocal(std_ref[...] + jnp.float32(1e-7), approx=False)  # (1, F)
    x = x_ref[...].astype(jnp.float32)
    if with_mean:
        x = x - mean_ref[...]
    o_ref[...] = (x * inv).astype(o_ref.dtype)


def scaler_forward(x, mean, std, *, with_mean=False, tm=None):
    """Forward pass of TensorStandardScaler: (x [- mean]) / (std + 1e-7)."""
    n, f = x.shape
    mean = jnp.asarray(mean, jnp.float32).reshape(1, f)
    std = jnp.asarray(std, jnp.float32).reshape(1, f)
    if tm is None:
        tm = _pick_tm(n, f, n_bufs=4)            # x and out both double-buffered
    n_pad = pl.cdiv(n, tm) * tm
    xp = jnp.pad(x, ((0, n_pad - n), (0, 0))) if n_pad != n else x

    out = pl.pallas_call(
        functools.partial(_scale_kernel, with_mean=with_mean),
        out_shape=jax.ShapeDtypeStruct((n_pad, f), x.dtype),
        grid_spec=pltpu.PrefetchScalarGridSpec(
            num_scalar_prefetch=0,
            grid=(n_pad // tm,),
            in_specs=[
                pl.BlockSpec((tm, f), lambda i: (i, 0)),
                pl.BlockSpec((1, f), lambda i: (0, 0)),
                pl.BlockSpec((1, f), lambda i: (0, 0)),
            ],
            out_specs=pl.BlockSpec((tm, f), lambda i: (i, 0)),
        ),
        compiler_params=pltpu.CompilerParams(
            dimension_semantics=("parallel",)),
    )(xp, mean, std)
    return out[:n] if n_pad != n else out


# ----------------------------------- main -----------------------------------

if __name__ == "__main__":
    key = jax.random.PRNGKey(0)

    def check(n, f):
        x = jax.random.normal(key, (n, f), dtype=jnp.float32) * 3.0 + 1.5

        mean, std = scaler_fit(x)
        y = scaler_forward(x, mean, std, with_mean=False)   # module default
        y_centered = scaler_forward(x, mean, std, with_mean=True)
        jax.block_until_ready((mean, std, y, y_centered))

        # reference (same semantics as torch.var_mean correction=0, then sqrt)
        ref_mean = jnp.mean(x, axis=0, keepdims=True)
        ref_std = jnp.sqrt(jnp.mean((x - ref_mean) ** 2, axis=0, keepdims=True))
        ref_y = x / (ref_std + 1e-7)
        ref_yc = (x - ref_mean) / (ref_std + 1e-7)

        assert jnp.allclose(mean, ref_mean, atol=1e-4, rtol=1e-4)
        assert jnp.allclose(std, ref_std, atol=1e-4, rtol=1e-4)
        assert jnp.allclose(y, ref_y, atol=1e-4, rtol=1e-4)
        assert jnp.allclose(y_centered, ref_yc, atol=1e-4, rtol=1e-4)

    check(64, 128)   # small aligned case
    check(50, 128)   # non-multiple-of-tile row count (exercises pad + slice path)
    print("KERNEL_OK")
</pallas_src>

<mosaic_0001>
module attributes {stable_mosaic.version = 11 : i64} {
  func.func @_fit_kernel(%arg0: i32, %arg1: i32, %arg2: memref<64x128xf32, #tpu.memory_space<vmem>>, %arg3: memref<8x128xf32, #tpu.memory_space<vmem>>, %arg4: memref<8x128xf32, #tpu.memory_space<vmem>>) attributes {dimension_semantics = [#tpu.dimension_semantics<parallel>, #tpu.dimension_semantics<arbitrary>], iteration_bounds = array<i64: 1, 1>, scalar_prefetch = 0 : i64, scratch_operands = 0 : i64, tpu.core_type = #tpu.core_type<tc>, window_params = [{transform_indices = @transform_0, window_bounds = array<i64: 64, 128>}, {transform_indices = @transform_1, window_bounds = array<i64: 8, 128>}, {transform_indices = @transform_2, window_bounds = array<i64: 8, 128>}]} {
    %c0_i32 = arith.constant 0 : i32
    %0 = arith.cmpi eq, %arg1, %c0_i32 : i32
    %1 = arith.extui %0 : i1 to i32
    %c0_i32_0 = arith.constant 0 : i32
    %2 = arith.cmpi ne, %1, %c0_i32_0 : i32
    scf.if %2 {
      %cst_11 = arith.constant 0.000000e+00 : f32
      %14 = vector.broadcast %cst_11 : f32 to vector<8x128xf32>
      %c0_12 = arith.constant 0 : index
      %c0_13 = arith.constant 0 : index
      %15 = vector.load %arg3[%c0_12, %c0_13] : memref<8x128xf32, #tpu.memory_space<vmem>>, vector<8x128xf32>
      tpu.vector_store %arg3[%c0_12, %c0_13], %14 {strides = array<i32>} : memref<8x128xf32, #tpu.memory_space<vmem>>, vector<8x128xf32>,
      %cst_14 = arith.constant 0.000000e+00 : f32
      %16 = vector.broadcast %cst_14 : f32 to vector<8x128xf32>
      %c0_15 = arith.constant 0 : index
      %c0_16 = arith.constant 0 : index
      %17 = vector.load %arg4[%c0_15, %c0_16] : memref<8x128xf32, #tpu.memory_space<vmem>>, vector<8x128xf32>
      tpu.vector_store %arg4[%c0_15, %c0_16], %16 {strides = array<i32>} : memref<8x128xf32, #tpu.memory_space<vmem>>, vector<8x128xf32>,
    } else {
    }
    %c0 = arith.constant 0 : index
    %c0_1 = arith.constant 0 : index
    %3 = vector.load %arg2[%c0, %c0_1] : memref<64x128xf32, #tpu.memory_space<vmem>>, vector<64x128xf32>
    %4 = vector.shape_cast %3 : vector<64x128xf32> to vector<8x8x128xf32>
    %c0_2 = arith.constant 0 : index
    %c0_3 = arith.constant 0 : index
    %5 = vector.load %arg3[%c0_2, %c0_3] : memref<8x128xf32, #tpu.memory_space<vmem>>, vector<8x128xf32>
    %cst = arith.constant dense<0.000000e+00> : vector<8x128xf32>
    %6 = vector.multi_reduction <add>, %4, %cst [0] : vector<8x8x128xf32> to vector<8x128xf32>
    %7 = arith.addf %5, %6 : vector<8x128xf32>
    %c0_4 = arith.constant 0 : index
    %c0_5 = arith.constant 0 : index
    %8 = vector.load %arg3[%c0_4, %c0_5] : memref<8x128xf32, #tpu.memory_space<vmem>>, vector<8x128xf32>
    tpu.vector_store %arg3[%c0_4, %c0_5], %7 {strides = array<i32>} : memref<8x128xf32, #tpu.memory_space<vmem>>, vector<8x128xf32>,
    %c0_6 = arith.constant 0 : index
    %c0_7 = arith.constant 0 : index
    %9 = vector.load %arg4[%c0_6, %c0_7] : memref<8x128xf32, #tpu.memory_space<vmem>>, vector<8x128xf32>
    %10 = arith.mulf %4, %4 : vector<8x8x128xf32>
    %cst_8 = arith.constant dense<0.000000e+00> : vector<8x128xf32>
    %11 = vector.multi_reduction <add>, %10, %cst_8 [0] : vector<8x8x128xf32> to vector<8x128xf32>
    %12 = arith.addf %9, %11 : vector<8x128xf32>
    %c0_9 = arith.constant 0 : index
    %c0_10 = arith.constant 0 : index
    %13 = vector.load %arg4[%c0_9, %c0_10] : memref<8x128xf32, #tpu.memory_space<vmem>>, vector<8x128xf32>
    tpu.vector_store %arg4[%c0_9, %c0_10], %12 {strides = array<i32>} : memref<8x128xf32, #tpu.memory_space<vmem>>, vector<8x128xf32>,
    return
  }
  func.func @transform_0(%arg0: i32, %arg1: i32) -> (i32, i32) {
    %c1_i32 = arith.constant 1 : i32
    %0 = arith.muli %arg0, %c1_i32 : i32
    %1 = arith.addi %0, %arg1 : i32
    %c0_i32 = arith.constant 0 : i32
    %c0_i32_0 = arith.constant 0 : i32
    return %1, %c0_i32 : i32, i32
  }
  func.func @transform_1(%arg0: i32, %arg1: i32) -> (i32, i32) {
    %c0_i32 = arith.constant 0 : i32
    %c0_i32_0 = arith.constant 0 : i32
    return %arg0, %c0_i32 : i32, i32
  }
  func.func @transform_2(%arg0: i32, %arg1: i32) -> (i32, i32) {
    %c0_i32 = arith.constant 0 : i32
    %c0_i32_0 = arith.constant 0 : i32
    return %arg0, %c0_i32 : i32, i32
  }
}

</mosaic_0001>

<bundles_post_ra>
// kernel: tpu_custom_call.1
= control target key start
LH: loop header
LB: loop body
LE: loop exit
PB: predicated region body
PF: predicated region fallthrough
CT: control target
= control target key end

     0   :  { %8 = vsyncpa [#allocation3], 0  ;;  %s204_s0 = inlined_call_operand.hbm [shape: f32[64,128], index: 0, kind: input, shape index: {}]   ;;  %s205_s1 = inlined_call_operand.hbm [shape: f32[8,128], index: 1, kind: output, shape index: {0}]   ;;  %s206_s2 = inlined_call_operand.hbm [shape: f32[8,128], index: 2, kind: output, shape index: {1}]  }
   0x1   :  { %9 = vsyncpa [#allocation4], 0 }
   0x2   :  { %10 = vsyncpa [#allocation7], 0  ;;  %s175_s9 = smov [#allocation2]  }
   0x3   :  { %s20_s10 = sshll.u32 %s175_s9, 4  ;;  %s21_s10 = int_to_ptr.vmem [resolvable:$true] %s20_s10 }
   0x4   :  { %s117_s11 = scalar_lea.vmem %s21_s10, 1024  ;;  %p122_p1 = scmp.lt.s32.totalorder %s21_s10, %s21_s10 }
   0x5   :  { %p118_p0 = scmp.ne.s32.totalorder %s21_s10, %s117_s11  ;;  %p123_p2 = scmp.lt.s32.totalorder %s117_s11, %s117_s11 }
   0x7   :  { %p124_p3 = por %p123_p2, %p122_p1 }
   0x9   :  { %p125_p4 = pnand %p124_p3, %p118_p0 }
   0xb   :  { %128 = shalt.err (!%p125_p4)
}
   0xc   :  { %s176_s12 = smov 128   ;;  %s177_s13 = smov 8  }
   0xd   :  { %26 = dma.hbm_to_vmem [thread:$0]  %s204_s0, 1024, %s21_s10, [#allocation3], %s176_s12, %s176_s12, %s177_s13  }
   0xe   :  { %169 = dma.done.wait [#allocation3], 1024  }
   0xf   :  { %170 = vsyncadd [#allocation3], 4294966272  ;;  %v38_v0 = vld [vmem:[#allocation2] sm:$0xff]  ;;  %v39_v1 = vld [vmem:[#allocation2 + $0x8] sm:$0xff]  ;;  %s178_s0 = smov [#allocation5]   ;;  %s179_s17 = smov [#allocation6]  }
  0x10   :  { %v40_v2 = vld [vmem:[#allocation2 + $0x10] sm:$0xff]  ;;  %v41_v3 = vld [vmem:[#allocation2 + $0x18] sm:$0xff]  ;;  %v47_v4 = vadd.f32 %v39_v1, %v38_v0  ;;  %v57_v5 = vmul.f32 %v38_v0, %v38_v0  ;;  %v58_v6 = vmul.f32 %v39_v1, %v39_v1  ;;  %v42_v8 = vld [vmem:[#allocation2 + $0x20] sm:$0xff]  ;;  %s80_s16 = sshll.u32 %s178_s0, 4  ;;  %s90_s18 = sshll.u32 %s179_s17, 4  ;;  %s81_s16 = int_to_ptr.vmem [resolvable:$true] %s80_s16  ;;  %s91_s18 = int_to_ptr.vmem [resolvable:$true] %s90_s18 }
  0x11   :  { %v59_v7 = vmul.f32 %v40_v2, %v40_v2  ;;  %v60_v10 = vmul.f32 %v41_v3, %v41_v3  ;;  %v43_v12 = vld [vmem:[#allocation2 + $0x28] sm:$0xff]  ;;  %v61_v14 = vmul.f32 %v42_v8, %v42_v8  ;;  %v44_v16 = vld [vmem:[#allocation2 + $0x30] sm:$0xff]  ;;  %v45_v20 = vld [vmem:[#allocation2 + $0x38] sm:$0xff]  ;;  %s129_s19 = scalar_lea.vmem %s81_s16, 128  ;;  %p134_p6 = scmp.lt.s32.totalorder %s81_s16, %s81_s16 }
  0x12   :  { %v48_v9 = vadd.f32 %v47_v4, %v40_v2  ;;  %v65_v11 = vadd.f32 %v58_v6, %v57_v5  ;;  %v62_v18 = vmul.f32 %v43_v12, %v43_v12  ;;  %v63_v22 = vmul.f32 %v44_v16, %v44_v16  ;;  %p130_p5 = scmp.ne.s32.totalorder %s81_s16, %s129_s19  ;;  %p135_p7 = scmp.lt.s32.totalorder %s129_s19, %s129_s19 }
  0x13   :  { %v64_v25 = vmul.f32 %v45_v20, %v45_v20 }
  0x14   :  { %v49_v13 = vadd.f32 %v48_v9, %v41_v3  ;;  %v66_v15 = vadd.f32 %v65_v11, %v59_v7  ;;  %p136_p8 = por %p135_p7, %p134_p6 }
  0x16   :  { %v50_v17 = vadd.f32 %v49_v13, %v42_v8  ;;  %v67_v19 = vadd.f32 %v66_v15, %v60_v10  ;;  %p137_p9 = pnand %p136_p8, %p130_p5 }
  0x18   :  { %v51_v21 = vadd.f32 %v50_v17, %v43_v12  ;;  %v68_v23 = vadd.f32 %v67_v19, %v61_v14 }
  0x1a   :  { %v52_v24 = vadd.f32 %v51_v21, %v44_v16  ;;  %v69_v26 = vadd.f32 %v68_v23, %v62_v18 }
  0x1c   :  { %v53_v27 = vadd.f32 %v52_v24, %v45_v20  ;;  %v70_v28 = vadd.f32 %v69_v26, %v63_v22 }
  0x1e   :  { %v71_v29 = vadd.f32 %v70_v28, %v64_v25  ;;  %55 = vst [vmem:[#allocation5] sm:$0xff] %v53_v27 }
  0x1f   :  { %140 = shalt.err (!%p137_p9)
}
  0x20   :  { %83 = dma.vmem_to_hbm [thread:$0]  %s81_s16, 128, %s205_s1, [#allocation4]   ;;  %73 = vst [vmem:[#allocation6] sm:$0xff] %v71_v29 }
  0x21   :  { %s149_s22 = scalar_lea.vmem %s91_s18, 128  ;;  %p154_p11 = scmp.lt.s32.totalorder %s91_s18, %s91_s18 }
  0x22   :  { %p150_p10 = scmp.ne.s32.totalorder %s91_s18, %s149_s22  ;;  %p155_p12 = scmp.lt.s32.totalorder %s149_s22, %s149_s22 }
  0x24   :  { %p156_p13 = por %p155_p12, %p154_p11 }
  0x26   :  { %p157_p0 = pnand %p156_p13, %p150_p10 }
  0x28   :  { %160 = shalt.err (!%p157_p0)
}
  0x29   :  { %93 = dma.vmem_to_hbm [thread:$0]  %s91_s18, 128, %s206_s2, [#allocation7]  }
  0x2a   :  { %171 = dma.done.wait [#allocation4], 128  }
  0x2b   :  { %172 = vsyncadd [#allocation4], 4294967168 }
  0x2c   :  { %173 = dma.done.wait [#allocation7], 128  }
  0x2d   :  { %174 = vsyncadd [#allocation7], 4294967168 }
  0x2e   :  { %100 = vsyncpa [#allocation3], 1 }
  0x2f   :  { %101 = vsyncpa [#allocation4], 1 }
  0x30   :  { %102 = vsyncpa [#allocation7], 1 }

</bundles_post_ra>
